<compile_context>
chip_gen: v7x
topology: tpu7x:2x2x1
jax: 0.10.0
libtpu: 0.0.40
codegen_flags: <defaults>
</compile_context>

<pallas_src>
import functools

import jax
import jax.numpy as jnp
from jax.experimental import pallas as pl
from jax.experimental.pallas import tpu as pltpu

BN_EPS = 1e-5
_LANE = 128
_ROWS_TARGET = 1024                  # flattened batch*length rows per grid step
_VMEM_LIMIT = 48 * 1024 * 1024       # fits every generation (v7x physical = 64 MiB)


def _round_up(x, m):
    return (x + m - 1) // m * m


def _unet_block_kernel(x_ref, w1_ref, s1_ref, t1_ref, w2_ref, s2_ref, t2_ref,
                       full_ref, *rest, last_block, with_pool):
    if with_pool:
        pool_ref, col_ref, h_ref = rest
    else:
        pool_ref = None
        col_ref, h_ref = rest

    BN, L, Cpi = x_ref.shape
    Cpo = w1_ref.shape[1]
    R = BN * L

    # ---- conv1 (k=3, pad=1): im2col lane blocks = [x[l-1] | x[l] | x[l+1]], one matmul ----
    zi = jnp.zeros((BN, 1, Cpi), jnp.float32)
    col_ref[:, :, Cpi:2 * Cpi] = x_ref[...]                       # center tap
    col_ref[:, 1:L, 0:Cpi] = x_ref[:, 0:L - 1, :]                 # left tap  x[l-1]
    col_ref[:, 0:1, 0:Cpi] = zi                                   # zero only the halo row
    col_ref[:, 0:L - 1, 2 * Cpi:3 * Cpi] = x_ref[:, 1:L, :]       # right tap x[l+1]
    col_ref[:, L - 1:L, 2 * Cpi:3 * Cpi] = zi

    a1 = col_ref[:, :, 0:3 * Cpi].reshape(R, 3 * Cpi).astype(jnp.bfloat16)
    acc1 = jnp.dot(a1, w1_ref[...], preferred_element_type=jnp.float32)
    # BatchNorm1 (eval; conv bias folded into shift) + Tanh; dropout = identity in eval
    h = jnp.tanh(acc1 * s1_ref[...] + t1_ref[...])
    h_ref[...] = (h + 1e-8).reshape(BN, L, Cpo)                   # conv2 input (module adds 1e-8)

    # ---- conv2 (k=3, pad=1): same im2col trick on h ----
    zo = jnp.zeros((BN, 1, Cpo), jnp.float32)
    col_ref[:, :, Cpo:2 * Cpo] = h_ref[...]
    col_ref[:, 1:L, 0:Cpo] = h_ref[:, 0:L - 1, :]
    col_ref[:, 0:1, 0:Cpo] = zo
    col_ref[:, 0:L - 1, 2 * Cpo:3 * Cpo] = h_ref[:, 1:L, :]
    col_ref[:, L - 1:L, 2 * Cpo:3 * Cpo] = zo

    a2 = col_ref[:, :, 0:3 * Cpo].reshape(R, 3 * Cpo).astype(jnp.bfloat16)
    acc2 = jnp.dot(a2, w2_ref[...], preferred_element_type=jnp.float32)
    y = jnp.tanh(acc2 * s2_ref[...] + t2_ref[...]).reshape(BN, L, Cpo)
    if last_block:
        # x = tanh(x); x = x - x.mean(dim=-1)  -> length axis is axis 1 in NLC layout
        y = y - jnp.mean(y, axis=1, keepdims=True)
    full_ref[...] = y.astype(full_ref.dtype)

    # ---- MaxPool1d(kernel=2, stride=2): single vectorized max of two strided loads ----
    if with_pool:
        L2 = pool_ref.shape[1]
        even = full_ref[:, pl.ds(0, L2, stride=2), :]
        odd = full_ref[:, pl.ds(1, L2, stride=2), :]
        pool_ref[...] = jnp.maximum(even, odd)


def init_params(key, in_channels, out_channels):
    """Deterministic synthetic parameters (no checkpoint loading)."""
    ks = jax.random.split(key, 6)
    w1 = 0.1 * jax.random.normal(ks[0], (3, in_channels, out_channels), jnp.float32)
    b1 = 0.1 * jax.random.normal(ks[1], (out_channels,), jnp.float32)
    w2 = 0.1 * jax.random.normal(ks[2], (3, out_channels, out_channels), jnp.float32)
    b2 = 0.1 * jax.random.normal(ks[3], (out_channels,), jnp.float32)

    def bn(k):
        k1, k2, k3, k4 = jax.random.split(k, 4)
        gamma = 1.0 + 0.1 * jax.random.normal(k1, (out_channels,), jnp.float32)
        beta = 0.1 * jax.random.normal(k2, (out_channels,), jnp.float32)
        rmean = 0.05 * jax.random.normal(k3, (out_channels,), jnp.float32)
        rvar = jax.random.uniform(k4, (out_channels,), jnp.float32, 0.5, 1.5)
        scale = gamma / jnp.sqrt(rvar + BN_EPS)
        shift = beta - rmean * scale
        return scale, shift

    s1, t1 = bn(ks[4])
    s2, t2 = bn(ks[5])
    return dict(w1=w1, b1=b1, s1=s1, t1=t1, w2=w2, b2=b2, s2=s2, t2=t2)


def _pick_batch_tile(N, L):
    bn = 1
    for d in range(1, N + 1):
        if N % d == 0 and d * L <= _ROWS_TARGET:
            bn = d
    return bn


def unet_block(x_ncl, params, *, downsample=True, last_block=False, batch_tile=None):
    """x_ncl: (N, C_in, L) PyTorch-style input. Returns (pooled, full) or full, NCL layout."""
    x_ncl = jnp.asarray(x_ncl, jnp.float32)
    N, Cin, L = x_ncl.shape
    Cout = params["w1"].shape[2]
    Cpi, Cpo = _round_up(Cin, _LANE), _round_up(Cout, _LANE)
    Cpm = max(Cpi, Cpo)
    L2 = L // 2

    # Channels-last (+1e-8 as the module does before conv1), lane-pad channels to 128.
    # TODO(synk): a chained UNet could keep this padded NLC layout between blocks and skip
    #             the boundary transposes (pure-bandwidth XLA passes).
    x = jnp.transpose(x_ncl, (0, 2, 1)) + 1e-8
    x = jnp.pad(x, ((0, 0), (0, 0), (0, Cpi - Cin)))

    def pad2(w, r, c):
        return jnp.pad(w, ((0, r - w.shape[0]), (0, c - w.shape[1])))

    # (3, Cin, Cout) -> (3*Cpad_in, Cpad_out), tap-major rows matching the im2col lane blocks.
    w1 = jnp.concatenate([pad2(params["w1"][k], Cpi, Cpo) for k in range(3)], 0).astype(jnp.bfloat16)
    w2 = jnp.concatenate([pad2(params["w2"][k], Cpo, Cpo) for k in range(3)], 0).astype(jnp.bfloat16)

    def vec(v, c):
        v = jnp.asarray(v, jnp.float32)
        return jnp.pad(v, (0, c - v.shape[0])).reshape(1, c)

    s1 = vec(params["s1"], Cpo)
    t1 = vec(params["b1"] * params["s1"] + params["t1"], Cpo)     # conv bias folded into BN shift
    s2 = vec(params["s2"], Cpo)
    t2 = vec(params["b2"] * params["s2"] + params["t2"], Cpo)

    bn = batch_tile if batch_tile is not None else _pick_batch_tile(N, L)
    assert N % bn == 0, "batch_tile must divide the batch size"
    grid = (N // bn,)

    in_specs = [
        pl.BlockSpec((bn, L, Cpi), lambda i: (i, 0, 0)),
        pl.BlockSpec((3 * Cpi, Cpo), lambda i: (0, 0)),
        pl.BlockSpec((1, Cpo), lambda i: (0, 0)),
        pl.BlockSpec((1, Cpo), lambda i: (0, 0)),
        pl.BlockSpec((3 * Cpo, Cpo), lambda i: (0, 0)),
        pl.BlockSpec((1, Cpo), lambda i: (0, 0)),
        pl.BlockSpec((1, Cpo), lambda i: (0, 0)),
    ]
    out_shape = [jax.ShapeDtypeStruct((N, L, Cpo), jnp.float32)]
    out_specs = [pl.BlockSpec((bn, L, Cpo), lambda i: (i, 0, 0))]
    if downsample:
        out_shape.append(jax.ShapeDtypeStruct((N, L2, Cpo), jnp.float32))
        out_specs.append(pl.BlockSpec((bn, L2, Cpo), lambda i: (i, 0, 0)))

    kernel = functools.partial(_unet_block_kernel, last_block=last_block, with_pool=downsample)
    outs = pl.pallas_call(
        kernel,
        grid=grid,
        in_specs=in_specs,
        out_specs=tuple(out_specs),
        out_shape=tuple(out_shape),
        scratch_shapes=[pltpu.VMEM((bn, L, 3 * Cpm), jnp.float32),   # shared im2col scratch
                        pltpu.VMEM((bn, L, Cpo), jnp.float32)],      # conv1 activation
        compiler_params=pltpu.CompilerParams(
            dimension_semantics=("parallel",),     # v7x: shard batch tiles across both TCs
            vmem_limit_bytes=_VMEM_LIMIT),
    )(x, w1, s1, t1, w2, s2, t2)

    full = jnp.transpose(outs[0][:, :, :Cout], (0, 2, 1))
    if downsample:
        pool = jnp.transpose(outs[1][:, :, :Cout], (0, 2, 1))
        return pool, full
    return full


def unet_block_ref(x_ncl, params, *, downsample=True, last_block=False):
    """Pure-JAX f32 reference mirroring the PyTorch forward (eval mode)."""
    def conv1d(x, w, b):
        wt = jnp.transpose(w, (2, 1, 0))                           # (Cout, Cin, K)
        y = jax.lax.conv_general_dilated(x, wt, window_strides=(1,), padding=((1, 1),),
                                         dimension_numbers=("NCH", "OIH", "NCH"))
        return y + b[None, :, None]

    def bn(y, scale, shift):
        return y * scale[None, :, None] + shift[None, :, None]

    h = jnp.tanh(bn(conv1d(x_ncl + 1e-8, params["w1"], params["b1"]), params["s1"], params["t1"]))
    y = bn(conv1d(h + 1e-8, params["w2"], params["b2"]), params["s2"], params["t2"])
    y = jnp.tanh(y)
    if last_block:
        y = y - y.mean(axis=-1, keepdims=True)
    if downsample:
        return jnp.maximum(y[:, :, 0::2], y[:, :, 1::2]), y
    return y


if __name__ == "__main__":
    # TODO(synk): dropout is stochastic / BatchNorm batch-stats are training-only; this kernel
    #             implements deterministic eval-mode semantics.
    key = jax.random.PRNGKey(0)
    kx, kp = jax.random.split(key)
    N, Cin, Cout, L = 2, 4, 8, 16

    x = jax.random.normal(kx, (N, Cin, L), jnp.float32)
    params = init_params(kp, Cin, Cout)

    run = jax.jit(unet_block, static_argnames=("downsample", "last_block", "batch_tile"))

    # batch_tile=1 -> grid of 2 steps: exercises the pipelined "parallel" grid path.
    pooled, full = run(x, params, downsample=True, last_block=False, batch_tile=1)
    jax.block_until_ready((pooled, full))
    assert pooled.shape == (N, Cout, L // 2)
    assert full.shape == (N, Cout, L)

    pooled_r, full_r = unet_block_ref(x, params, downsample=True, last_block=False)
    # bf16 MXU operands (f32 accumulation) -> small drift vs. the all-f32 reference.
    TOL = dict(atol=3e-2, rtol=3e-2)
    assert jnp.allclose(full, full_r, **TOL), float(jnp.max(jnp.abs(full - full_r)))
    assert jnp.allclose(pooled, pooled_r, **TOL), float(jnp.max(jnp.abs(pooled - pooled_r)))

    # last_block path (tanh + per-length mean subtraction), no pooled output.
    y2 = run(x, params, downsample=False, last_block=True)
    jax.block_until_ready(y2)
    y2_r = unet_block_ref(x, params, downsample=False, last_block=True)
    assert y2.shape == (N, Cout, L)
    assert jnp.allclose(y2, y2_r, **TOL), float(jnp.max(jnp.abs(y2 - y2_r)))

    print("KERNEL_OK")
</pallas_src>

<mosaic_0001>
module attributes {stable_mosaic.version = 11 : i64} {
  func.func @_unet_block_kernel(%arg0: i32, %arg1: memref<1x16x128xf32, #tpu.memory_space<vmem>>, %arg2: memref<384x128xbf16, #tpu.memory_space<vmem>>, %arg3: memref<1x128xf32, #tpu.memory_space<vmem>>, %arg4: memref<1x128xf32, #tpu.memory_space<vmem>>, %arg5: memref<384x128xbf16, #tpu.memory_space<vmem>>, %arg6: memref<1x128xf32, #tpu.memory_space<vmem>>, %arg7: memref<1x128xf32, #tpu.memory_space<vmem>>, %arg8: memref<1x16x128xf32, #tpu.memory_space<vmem>>, %arg9: memref<1x8x128xf32, #tpu.memory_space<vmem>>, %arg10: memref<1x16x384xf32, #tpu.memory_space<vmem>>, %arg11: memref<1x16x128xf32, #tpu.memory_space<vmem>>) attributes {dimension_semantics = [#tpu.dimension_semantics<parallel>], iteration_bounds = array<i64: 2>, scalar_prefetch = 0 : i64, scratch_operands = 2 : i64, tpu.core_type = #tpu.core_type<tc>, window_params = [{transform_indices = @transform_0, window_bounds = array<i64: 1, 16, 128>}, {pipeline_mode = #tpu.pipeline_mode<synchronous>, transform_indices = @transform_1, window_bounds = array<i64: 384, 128>}, {pipeline_mode = #tpu.pipeline_mode<synchronous>, transform_indices = @transform_2, window_bounds = array<i64: 1, 128>}, {pipeline_mode = #tpu.pipeline_mode<synchronous>, transform_indices = @transform_3, window_bounds = array<i64: 1, 128>}, {pipeline_mode = #tpu.pipeline_mode<synchronous>, transform_indices = @transform_4, window_bounds = array<i64: 384, 128>}, {pipeline_mode = #tpu.pipeline_mode<synchronous>, transform_indices = @transform_5, window_bounds = array<i64: 1, 128>}, {pipeline_mode = #tpu.pipeline_mode<synchronous>, transform_indices = @transform_6, window_bounds = array<i64: 1, 128>}, {transform_indices = @transform_7, window_bounds = array<i64: 1, 16, 128>}, {transform_indices = @transform_8, window_bounds = array<i64: 1, 8, 128>}]} {
    %cst = arith.constant 0.000000e+00 : f32
    %0 = vector.broadcast %cst : f32 to vector<1x1x128xf32>
    %c0 = arith.constant 0 : index
    %c0_0 = arith.constant 0 : index
    %c0_1 = arith.constant 0 : index
    %1 = vector.load %arg1[%c0, %c0_0, %c0_1] : memref<1x16x128xf32, #tpu.memory_space<vmem>>, vector<1x16x128xf32>
    %c0_2 = arith.constant 0 : index
    %c0_3 = arith.constant 0 : index
    %c128 = arith.constant 128 : index
    %2 = vector.load %arg10[%c0_2, %c0_3, %c128] : memref<1x16x384xf32, #tpu.memory_space<vmem>>, vector<1x16x128xf32>
    tpu.vector_store %arg10[%c0_2, %c0_3, %c128], %1 {strides = array<i32>} : memref<1x16x384xf32, #tpu.memory_space<vmem>>, vector<1x16x128xf32>,
    %c0_4 = arith.constant 0 : index
    %c0_5 = arith.constant 0 : index
    %c0_6 = arith.constant 0 : index
    %3 = vector.load %arg1[%c0_4, %c0_5, %c0_6] : memref<1x16x128xf32, #tpu.memory_space<vmem>>, vector<1x15x128xf32>
    %c0_7 = arith.constant 0 : index
    %c1 = arith.constant 1 : index
    %c0_8 = arith.constant 0 : index
    %4 = vector.load %arg10[%c0_7, %c1, %c0_8] : memref<1x16x384xf32, #tpu.memory_space<vmem>>, vector<1x15x128xf32>
    tpu.vector_store %arg10[%c0_7, %c1, %c0_8], %3 {strides = array<i32>} : memref<1x16x384xf32, #tpu.memory_space<vmem>>, vector<1x15x128xf32>,
    %c0_9 = arith.constant 0 : index
    %c0_10 = arith.constant 0 : index
    %c0_11 = arith.constant 0 : index
    %5 = vector.load %arg10[%c0_9, %c0_10, %c0_11] : memref<1x16x384xf32, #tpu.memory_space<vmem>>, vector<1x1x128xf32>
    tpu.vector_store %arg10[%c0_9, %c0_10, %c0_11], %0 {strides = array<i32>} : memref<1x16x384xf32, #tpu.memory_space<vmem>>, vector<1x1x128xf32>,
    %c0_12 = arith.constant 0 : index
    %c1_13 = arith.constant 1 : index
    %c0_14 = arith.constant 0 : index
    %6 = vector.load %arg1[%c0_12, %c1_13, %c0_14] : memref<1x16x128xf32, #tpu.memory_space<vmem>>, vector<1x15x128xf32>
    %c0_15 = arith.constant 0 : index
    %c0_16 = arith.constant 0 : index
    %c256 = arith.constant 256 : index
    %7 = vector.load %arg10[%c0_15, %c0_16, %c256] : memref<1x16x384xf32, #tpu.memory_space<vmem>>, vector<1x15x128xf32>
    tpu.vector_store %arg10[%c0_15, %c0_16, %c256], %6 {strides = array<i32>} : memref<1x16x384xf32, #tpu.memory_space<vmem>>, vector<1x15x128xf32>,
    %c0_17 = arith.constant 0 : index
    %c15 = arith.constant 15 : index
    %c256_18 = arith.constant 256 : index
    %8 = vector.load %arg10[%c0_17, %c15, %c256_18] : memref<1x16x384xf32, #tpu.memory_space<vmem>>, vector<1x1x128xf32>
    tpu.vector_store %arg10[%c0_17, %c15, %c256_18], %0 {strides = array<i32>} : memref<1x16x384xf32, #tpu.memory_space<vmem>>, vector<1x1x128xf32>,
    %c0_19 = arith.constant 0 : index
    %c0_20 = arith.constant 0 : index
    %c0_21 = arith.constant 0 : index
    %9 = vector.load %arg10[%c0_19, %c0_20, %c0_21] : memref<1x16x384xf32, #tpu.memory_space<vmem>>, vector<1x16x384xf32>
    %10 = vector.shape_cast %9 : vector<1x16x384xf32> to vector<16x384xf32>
    %11 = arith.truncf %10 : vector<16x384xf32> to vector<16x384xbf16>
    %c0_22 = arith.constant 0 : index
    %c0_23 = arith.constant 0 : index
    %12 = vector.load %arg2[%c0_22, %c0_23] : memref<384x128xbf16, #tpu.memory_space<vmem>>, vector<384x128xbf16>
    %cst_24 = arith.constant dense<0.000000e+00> : vector<16x128xf32>
    %13 = tpu.matmul %11, %12, %cst_24 {dimension_numbers = #tpu.dot_dimension_numbers<[1], [0], [0], [1], [0, 0, 1, 1], [], []>} : vector<16x384xbf16>, vector<384x128xbf16>, vector<16x128xf32> -> vector<16x128xf32>
    %c0_25 = arith.constant 0 : index
    %c0_26 = arith.constant 0 : index
    %14 = vector.load %arg3[%c0_25, %c0_26] : memref<1x128xf32, #tpu.memory_space<vmem>>, vector<1x128xf32>
    %15 = vector.broadcast %14 : vector<1x128xf32> to vector<16x128xf32>
    %16 = arith.mulf %13, %15 : vector<16x128xf32>
    %c0_27 = arith.constant 0 : index
    %c0_28 = arith.constant 0 : index
    %17 = vector.load %arg4[%c0_27, %c0_28] : memref<1x128xf32, #tpu.memory_space<vmem>>, vector<1x128xf32>
    %18 = vector.broadcast %17 : vector<1x128xf32> to vector<16x128xf32>
    %19 = arith.addf %16, %18 : vector<16x128xf32>
    %20 = math.tanh %19 : vector<16x128xf32>
    %cst_29 = arith.constant 9.99999993E-9 : f32
    %21 = vector.broadcast %cst_29 : f32 to vector<16x128xf32>
    %22 = arith.addf %20, %21 : vector<16x128xf32>
    %23 = vector.shape_cast %22 : vector<16x128xf32> to vector<1x16x128xf32>
    %c0_30 = arith.constant 0 : index
    %c0_31 = arith.constant 0 : index
    %c0_32 = arith.constant 0 : index
    %24 = vector.load %arg11[%c0_30, %c0_31, %c0_32] : memref<1x16x128xf32, #tpu.memory_space<vmem>>, vector<1x16x128xf32>
    tpu.vector_store %arg11[%c0_30, %c0_31, %c0_32], %23 {strides = array<i32>} : memref<1x16x128xf32, #tpu.memory_space<vmem>>, vector<1x16x128xf32>,
    %cst_33 = arith.constant 0.000000e+00 : f32
    %25 = vector.broadcast %cst_33 : f32 to vector<1x1x128xf32>
    %c0_34 = arith.constant 0 : index
    %c0_35 = arith.constant 0 : index
    %c0_36 = arith.constant 0 : index
    %26 = vector.load %arg11[%c0_34, %c0_35, %c0_36] : memref<1x16x128xf32, #tpu.memory_space<vmem>>, vector<1x16x128xf32>
    %c0_37 = arith.constant 0 : index
    %c0_38 = arith.constant 0 : index
    %c128_39 = arith.constant 128 : index
    %27 = vector.load %arg10[%c0_37, %c0_38, %c128_39] : memref<1x16x384xf32, #tpu.memory_space<vmem>>, vector<1x16x128xf32>
    tpu.vector_store %arg10[%c0_37, %c0_38, %c128_39], %26 {strides = array<i32>} : memref<1x16x384xf32, #tpu.memory_space<vmem>>, vector<1x16x128xf32>,
    %c0_40 = arith.constant 0 : index
    %c0_41 = arith.constant 0 : index
    %c0_42 = arith.constant 0 : index
    %28 = vector.load %arg11[%c0_40, %c0_41, %c0_42] : memref<1x16x128xf32, #tpu.memory_space<vmem>>, vector<1x15x128xf32>
    %c0_43 = arith.constant 0 : index
    %c1_44 = arith.constant 1 : index
    %c0_45 = arith.constant 0 : index
    %29 = vector.load %arg10[%c0_43, %c1_44, %c0_45] : memref<1x16x384xf32, #tpu.memory_space<vmem>>, vector<1x15x128xf32>
    tpu.vector_store %arg10[%c0_43, %c1_44, %c0_45], %28 {strides = array<i32>} : memref<1x16x384xf32, #tpu.memory_space<vmem>>, vector<1x15x128xf32>,
    %c0_46 = arith.constant 0 : index
    %c0_47 = arith.constant 0 : index
    %c0_48 = arith.constant 0 : index
    %30 = vector.load %arg10[%c0_46, %c0_47, %c0_48] : memref<1x16x384xf32, #tpu.memory_space<vmem>>, vector<1x1x128xf32>
    tpu.vector_store %arg10[%c0_46, %c0_47, %c0_48], %25 {strides = array<i32>} : memref<1x16x384xf32, #tpu.memory_space<vmem>>, vector<1x1x128xf32>,
    %c0_49 = arith.constant 0 : index
    %c1_50 = arith.constant 1 : index
    %c0_51 = arith.constant 0 : index
    %31 = vector.load %arg11[%c0_49, %c1_50, %c0_51] : memref<1x16x128xf32, #tpu.memory_space<vmem>>, vector<1x15x128xf32>
    %c0_52 = arith.constant 0 : index
    %c0_53 = arith.constant 0 : index
    %c256_54 = arith.constant 256 : index
    %32 = vector.load %arg10[%c0_52, %c0_53, %c256_54] : memref<1x16x384xf32, #tpu.memory_space<vmem>>, vector<1x15x128xf32>
    tpu.vector_store %arg10[%c0_52, %c0_53, %c256_54], %31 {strides = array<i32>} : memref<1x16x384xf32, #tpu.memory_space<vmem>>, vector<1x15x128xf32>,
    %c0_55 = arith.constant 0 : index
    %c15_56 = arith.constant 15 : index
    %c256_57 = arith.constant 256 : index
    %33 = vector.load %arg10[%c0_55, %c15_56, %c256_57] : memref<1x16x384xf32, #tpu.memory_space<vmem>>, vector<1x1x128xf32>
    tpu.vector_store %arg10[%c0_55, %c15_56, %c256_57], %25 {strides = array<i32>} : memref<1x16x384xf32, #tpu.memory_space<vmem>>, vector<1x1x128xf32>,
    %c0_58 = arith.constant 0 : index
    %c0_59 = arith.constant 0 : index
    %c0_60 = arith.constant 0 : index
    %34 = vector.load %arg10[%c0_58, %c0_59, %c0_60] : memref<1x16x384xf32, #tpu.memory_space<vmem>>, vector<1x16x384xf32>
    %35 = vector.shape_cast %34 : vector<1x16x384xf32> to vector<16x384xf32>
    %36 = arith.truncf %35 : vector<16x384xf32> to vector<16x384xbf16>
    %c0_61 = arith.constant 0 : index
    %c0_62 = arith.constant 0 : index
    %37 = vector.load %arg5[%c0_61, %c0_62] : memref<384x128xbf16, #tpu.memory_space<vmem>>, vector<384x128xbf16>
    %cst_63 = arith.constant dense<0.000000e+00> : vector<16x128xf32>
    %38 = tpu.matmul %36, %37, %cst_63 {dimension_numbers = #tpu.dot_dimension_numbers<[1], [0], [0], [1], [0, 0, 1, 1], [], []>} : vector<16x384xbf16>, vector<384x128xbf16>, vector<16x128xf32> -> vector<16x128xf32>
    %c0_64 = arith.constant 0 : index
    %c0_65 = arith.constant 0 : index
    %39 = vector.load %arg6[%c0_64, %c0_65] : memref<1x128xf32, #tpu.memory_space<vmem>>, vector<1x128xf32>
    %40 = vector.broadcast %39 : vector<1x128xf32> to vector<16x128xf32>
    %41 = arith.mulf %38, %40 : vector<16x128xf32>
    %c0_66 = arith.constant 0 : index
    %c0_67 = arith.constant 0 : index
    %42 = vector.load %arg7[%c0_66, %c0_67] : memref<1x128xf32, #tpu.memory_space<vmem>>, vector<1x128xf32>
    %43 = vector.broadcast %42 : vector<1x128xf32> to vector<16x128xf32>
    %44 = arith.addf %41, %43 : vector<16x128xf32>
    %45 = math.tanh %44 : vector<16x128xf32>
    %46 = vector.shape_cast %45 : vector<16x128xf32> to vector<1x16x128xf32>
    %c0_68 = arith.constant 0 : index
    %c0_69 = arith.constant 0 : index
    %c0_70 = arith.constant 0 : index
    %47 = vector.load %arg8[%c0_68, %c0_69, %c0_70] : memref<1x16x128xf32, #tpu.memory_space<vmem>>, vector<1x16x128xf32>
    tpu.vector_store %arg8[%c0_68, %c0_69, %c0_70], %46 {strides = array<i32>} : memref<1x16x128xf32, #tpu.memory_space<vmem>>, vector<1x16x128xf32>,
    %c0_71 = arith.constant 0 : index
    %c0_72 = arith.constant 0 : index
    %c0_73 = arith.constant 0 : index
    %48 = tpu.strided_load %arg8[%c0_71, %c0_72, %c0_73] {strides = array<i32: 1, 2, 1>} : memref<1x16x128xf32, #tpu.memory_space<vmem>>, vector<1x8x128xf32>
    %c0_74 = arith.constant 0 : index
    %c1_75 = arith.constant 1 : index
    %c0_76 = arith.constant 0 : index
    %49 = tpu.strided_load %arg8[%c0_74, %c1_75, %c0_76] {strides = array<i32: 1, 2, 1>} : memref<1x16x128xf32, #tpu.memory_space<vmem>>, vector<1x8x128xf32>
    %50 = arith.maximumf %48, %49 : vector<1x8x128xf32>
    %c0_77 = arith.constant 0 : index
    %c0_78 = arith.constant 0 : index
    %c0_79 = arith.constant 0 : index
    %51 = vector.load %arg9[%c0_77, %c0_78, %c0_79] : memref<1x8x128xf32, #tpu.memory_space<vmem>>, vector<1x8x128xf32>
    tpu.vector_store %arg9[%c0_77, %c0_78, %c0_79], %50 {strides = array<i32>} : memref<1x8x128xf32, #tpu.memory_space<vmem>>, vector<1x8x128xf32>,
    return
  }
  func.func @transform_0(%arg0: i32) -> (i32, i32, i32) {
    %c0_i32 = arith.constant 0 : i32
    %c0_i32_0 = arith.constant 0 : i32
    %c0_i32_1 = arith.constant 0 : i32
    return %arg0, %c0_i32, %c0_i32_0 : i32, i32, i32
  }
  func.func @transform_1(%arg0: i32) -> (i32, i32) {
    %c0_i32 = arith.constant 0 : i32
    %c0_i32_0 = arith.constant 0 : i32
    %c0_i32_1 = arith.constant 0 : i32
    return %c0_i32, %c0_i32_0 : i32, i32
  }
  func.func @transform_2(%arg0: i32) -> (i32, i32) {
    %c0_i32 = arith.constant 0 : i32
    %c0_i32_0 = arith.constant 0 : i32
    %c0_i32_1 = arith.constant 0 : i32
    return %c0_i32, %c0_i32_0 : i32, i32
  }
  func.func @transform_3(%arg0: i32) -> (i32, i32) {
    %c0_i32 = arith.constant 0 : i32
    %c0_i32_0 = arith.constant 0 : i32
    %c0_i32_1 = arith.constant 0 : i32
    return %c0_i32, %c0_i32_0 : i32, i32
  }
  func.func @transform_4(%arg0: i32) -> (i32, i32) {
    %c0_i32 = arith.constant 0 : i32
    %c0_i32_0 = arith.constant 0 : i32
    %c0_i32_1 = arith.constant 0 : i32
    return %c0_i32, %c0_i32_0 : i32, i32
  }
  func.func @transform_5(%arg0: i32) -> (i32, i32) {
    %c0_i32 = arith.constant 0 : i32
    %c0_i32_0 = arith.constant 0 : i32
    %c0_i32_1 = arith.constant 0 : i32
    return %c0_i32, %c0_i32_0 : i32, i32
  }
  func.func @transform_6(%arg0: i32) -> (i32, i32) {
    %c0_i32 = arith.constant 0 : i32
    %c0_i32_0 = arith.constant 0 : i32
    %c0_i32_1 = arith.constant 0 : i32
    return %c0_i32, %c0_i32_0 : i32, i32
  }
  func.func @transform_7(%arg0: i32) -> (i32, i32, i32) {
    %c0_i32 = arith.constant 0 : i32
    %c0_i32_0 = arith.constant 0 : i32
    %c0_i32_1 = arith.constant 0 : i32
    return %arg0, %c0_i32, %c0_i32_0 : i32, i32, i32
  }
  func.func @transform_8(%arg0: i32) -> (i32, i32, i32) {
    %c0_i32 = arith.constant 0 : i32
    %c0_i32_0 = arith.constant 0 : i32
    %c0_i32_1 = arith.constant 0 : i32
    return %arg0, %c0_i32, %c0_i32_0 : i32, i32, i32
  }
}

</mosaic_0001>

<bundles_post_ra>
// kernel: unet_block.1
= control target key start
LH: loop header
LB: loop body
LE: loop exit
PB: predicated region body
PF: predicated region fallthrough
CT: control target
= control target key end

     0   :  { %s1354_s27 = smov 0   ;;  %s1568_s0 = inlined_call_operand.vmem [shape: f32[2,16,128], index: 0, kind: input, shape index: {}]   ;;  %s1569_s1 = inlined_call_operand.vmem [shape: bf16[384,128], index: 1, kind: input, shape index: {}]   ;;  %s1570_s2 = inlined_call_operand.vmem [shape: f32[1,128], index: 2, kind: input, shape index: {}]   ;;  %s1571_s3 = inlined_call_operand.vmem [shape: f32[1,128], index: 3, kind: input, shape index: {}]   ;;  %s1572_s4 = inlined_call_operand.vmem [shape: bf16[384,128], index: 4, kind: input, shape index: {}]   ;;  %s1573_s5 = inlined_call_operand.vmem [shape: f32[1,128], index: 5, kind: input, shape index: {}]   ;;  %s1574_s6 = inlined_call_operand.vmem [shape: f32[1,128], index: 6, kind: input, shape index: {}]   ;;  %s1575_s7 = inlined_call_operand.vmem [shape: f32[2,16,128], index: 7, kind: output, shape index: {0}]   ;;  %s1576_s8 = inlined_call_operand.vmem [shape: f32[2,8,128], index: 8, kind: output, shape index: {1}]  }
   0x1 LB: > { %s1064_s28 = sadd.s32 4294967295, %s1305_s27   ;;  %p1068_p0 = scmp.ge.s32.totalorder %s1305_s27, 1  ;;  %s1305_s27 = sphi %s1354_s27, %s19_s27  }
   0x2   : > { %p265_p1 = scmp.lt.s32.totalorder %s1305_s27, 3 }
   0x4   : > { %p266_p2 = pnand %p1068_p0, %p265_p1 }
   0x5   : > { %v1243_v0 = vld [vmem:[%s1569_s1 + $0x40] sm:$0xff] (!%p266_p2)   ;;  %v1307_v1 = vmov (!%p266_p2), 0.0   ;;  %v1246_v4 = vld [vmem:[%s1569_s1 + $0x48] sm:$0xff] (!%p266_p2)   ;;  %vm1308_vm0 = vmmov (!%p266_p2), 0   ;;  %v1249_v7 = vld [vmem:[%s1569_s1 + $0x50] sm:$0xff] (!%p266_p2)   ;;  %p303_p3 = scmp.lt.s32.totalorder (!%p266_p2), %s1064_s28, 1 }
   0x6   : > { %269 = sbr.rel (%p266_p2) target bundleno = 535 (0x217), region = 48  ;;  %1193 = vmatprep.subr.bf16.mxu1 (!%p266_p2), %v1307_v1  ;;  %334 = vst [vmem:[#allocation2] sm:$0x1] (!%p266_p2), %v1307_v1  ;;  %339 = vst [vmem:[#allocation2 + $0x2f] sm:$0x1] (!%p266_p2), %v1307_v1  ;;  %v1244_v2 = vld [vmem:[%s1569_s1] sm:$0xff] (!%p266_p2)   ;;  %1131 = vmatprep.subr.bf16.mxu0 (!%p266_p2), %v1243_v0 }
   0x7   : > { %v1245_v3 = vld [vmem:[%s1569_s1 + $0x80] sm:$0xff] (!%p266_p2)   ;;  %1132 = vmatpush3.bf16.msra.mxu0 (!%p266_p2), %v1244_v2  ;;  %1209 = vmatprep.mubr.msk.bf16.mxu1 (!%p266_p2), %vm1308_vm0, %v1307_v1  ;;  %v1247_v5 = vld [vmem:[%s1569_s1 + $0x8] sm:$0xff] (!%p266_p2)   ;;  %v1250_v8 = vld [vmem:[%s1569_s1 + $0x10] sm:$0xff] (!%p266_p2)   ;;  %vm326_vm1 = vcmask (!%p266_p2), 1040384  }
   0x8   : > { %1194 = vmatpush3.bf16.msra.mxu1 (!%p266_p2), %v1245_v3  ;;  %1133 = vmatprep.subr.bf16.mxu0 (!%p266_p2), %v1246_v4  ;;  %v1248_v6 = vld [vmem:[%s1569_s1 + $0x88] sm:$0xff] (!%p266_p2)   ;;  %v1251_v9 = vld [vmem:[%s1569_s1 + $0x90] sm:$0xff] (!%p266_p2)   ;;  %v1252_v10 = vld [vmem:[%s1569_s1 + $0x58] sm:$0xff] (!%p266_p2)  }
   0x9   : > { %1195 = vmatprep.subr.bf16.mxu1 (!%p266_p2), %v1307_v1  ;;  %v1253_v11 = vld [vmem:[%s1569_s1 + $0x18] sm:$0xff] (!%p266_p2)   ;;  %v1255_v13 = vld [vmem:[%s1569_s1 + $0x60] sm:$0xff] (!%p266_p2)   ;;  %v1258_v16 = vld [vmem:[%s1569_s1 + $0x68] sm:$0xff] (!%p266_p2)  }
   0xa   : > { %v1254_v12 = vld [vmem:[%s1569_s1 + $0x98] sm:$0xff] (!%p266_p2)   ;;  %v1256_v14 = vld [vmem:[%s1569_s1 + $0x20] sm:$0xff] (!%p266_p2)   ;;  %v1259_v17 = vld [vmem:[%s1569_s1 + $0x28] sm:$0xff] (!%p266_p2)  }
   0xb   : > { %1134 = vmatpush3.bf16.msra.mxu0 (!%p266_p2), %v1247_v5  ;;  %v1257_v15 = vld [vmem:[%s1569_s1 + $0xa0] sm:$0xff] (!%p266_p2)   ;;  %v1260_v18 = vld [vmem:[%s1569_s1 + $0xa8] sm:$0xff] (!%p266_p2)   ;;  %v1261_v19 = vld [vmem:[%s1569_s1 + $0x70] sm:$0xff] (!%p266_p2)  }
   0xc   : > { %1196 = vmatpush3.bf16.msra.mxu1 (!%p266_p2), %v1248_v6  ;;  %1135 = vmatprep.subr.bf16.mxu0 (!%p266_p2), %v1249_v7  ;;  %v1262_v20 = vld [vmem:[%s1569_s1 + $0x30] sm:$0xff] (!%p266_p2)   ;;  %v1264_v22 = vld [vmem:[%s1569_s1 + $0x78] sm:$0xff] (!%p266_p2)   ;;  %v1268_v38 = vld [vmem:[%s1572_s4 + $0x40] sm:$0xff] (!%p266_p2)  }
   0xd   : > { %1197 = vmatprep.subr.bf16.mxu1 %v1307_v1  ;;  %s1578_s28 = smov (!%p303_p3, %s1064_s28), 1  ;;  %v1263_v21 = vld [vmem:[%s1569_s1 + $0xb0] sm:$0xff]   ;;  %v1265_v26 = vld [vmem:[%s1569_s1 + $0x38] sm:$0xff]   ;;  %v1269_v39 = vld [vmem:[%s1572_s4] sm:$0xff]  }
   0xe   : > { %s1129_s21 = sshll.u32 %s1578_s28, 4  ;;  %v1266_v31 = vld [vmem:[%s1569_s1 + $0xb8] sm:$0xff]   ;;  %v1271_v40 = vld [vmem:[%s1572_s4 + $0x48] sm:$0xff]   ;;  %v1267_v42 = vld [vmem:[%s1572_s4 + $0x80] sm:$0xff]   ;;  %s1073_s22 = sshll.u32 %s1578_s28, 3 }
   0xf   : > { %1136 = vmatpush3.bf16.msra.mxu0 %v1250_v8  ;;  %s307_s10 = scalar_lea.vmem %s1568_s0, %s1129_s21  ;;  %v1272_v41 = vld [vmem:[%s1572_s4 + $0x8] sm:$0xff]   ;;  %v1274_v43 = vld [vmem:[%s1572_s4 + $0x50] sm:$0xff]   ;;  %v1277_v46 = vld [vmem:[%s1572_s4 + $0x58] sm:$0xff]   ;;  %s312_s20 = scalar_lea.vmem %s1575_s7, %s1129_s21 }
  0x10   : > { %1198 = vmatpush3.bf16.msra.mxu1 %v1251_v9  ;;  %1137 = vmatprep.subr.bf16.mxu0 %v1252_v10  ;;  %v318_v23 = vld [vmem:[%s307_s10] sm:$0xff]  ;;  %v319_v24 = vld [vmem:[%s307_s10 + $0x8] sm:$0xff]  ;;  %v1275_v44 = vld [vmem:[%s1572_s4 + $0x10] sm:$0xff]   ;;  %s316_s25 = scalar_lea.vmem %s1576_s8, %s1073_s22 }
  0x11   : > { %1199 = vmatprep.subr.bf16.mxu1 %v1307_v1  ;;  %v323_v25 = vld [vmem:[%s307_s10 + $0x8] sm:$0x7f]  ;;  %v347_v27 = vpack.c.bf16 %v319_v24, %v318_v23  ;;  %v327_v28 = vrot.slane %v318_v23, 7  ;;  %v1278_v47 = vld [vmem:[%s1572_s4 + $0x18] sm:$0xff]   ;;  %v1273_v48 = vld [vmem:[%s1572_s4 + $0x90] sm:$0xff]  }
  0x12   : > { %v328_v29 = vrot.slane %v323_v25, 7  ;;  %v336_v30 = vld [vmem:[%s307_s10 + $0x9] sm:$0x7f]  ;;  %v335_v32 = vld [vmem:[%s307_s10 + $0x1] sm:$0xff]  ;;  %v1276_v51 = vld [vmem:[%s1572_s4 + $0x98] sm:$0xff]  }
  0x13   : > { %1138 = vmatpush3.bf16.msra.mxu0 %v1253_v11  ;;  %338 = vst [vmem:[#allocation2 + $0x28] sm:$0x7f] %v336_v30  ;;  %573 = vmatprep.mubr.bf16.mxu0 %v347_v27  ;;  %332 = vst [vmem:[#allocation2] sm:$0xfe] %v327_v28  ;;  %v1270_v45 = vld [vmem:[%s1572_s4 + $0x88] sm:$0xff]   ;;  %v1280_v49 = vld [vmem:[%s1572_s4 + $0x60] sm:$0xff]  }
  0x14   : > { %1200 = vmatpush3.bf16.msra.mxu1 %v1254_v12  ;;  %1139 = vmatprep.subr.bf16.mxu0 %v1255_v13  ;;  %v329_v33 = vsel %vm326_vm1, %v327_v28, %v328_v29  ;;  %v1281_v50 = vld [vmem:[%s1572_s4 + $0x20] sm:$0xff]   ;;  %v1283_v52 = vld [vmem:[%s1572_s4 + $0x68] sm:$0xff]   ;;  %v1286_v55 = vld [vmem:[%s1572_s4 + $0x70] sm:$0xff]  }
  0x15   : > { %1201 = vmatprep.subr.bf16.mxu1 %v1307_v1  ;;  %v1284_v53 = vld [vmem:[%s1572_s4 + $0x28] sm:$0xff]   ;;  %v1279_v54 = vld [vmem:[%s1572_s4 + $0xa0] sm:$0xff]   ;;  %v1287_v56 = vld [vmem:[%s1572_s4 + $0x30] sm:$0xff]  }
  0x16   : > { %v1282_v57 = vld [vmem:[%s1572_s4 + $0xa8] sm:$0xff]   ;;  %v1289_v58 = vld [vmem:[%s1572_s4 + $0x78] sm:$0xff]   ;;  %v1285_v59 = vld [vmem:[%s1572_s4 + $0xb0] sm:$0xff]  }
  0x17   : > { %1140 = vmatpush3.bf16.msra.mxu0 %v1256_v14  ;;  %v1290_v60 = vld [vmem:[%s1572_s4 + $0x38] sm:$0xff]   ;;  %v1098_v7 = vld [vmem:[%s1570_s2] ss:$0 sm:$0xff] }
  0x18   : > { %1202 = vmatpush3.bf16.msra.mxu1 %v1257_v15  ;;  %1141 = vmatprep.subr.bf16.mxu0 %v1258_v16  ;;  %v1288_v61 = vld [vmem:[%s1572_s4 + $0xb8] sm:$0xff]  }
  0x19   : > { %1203 = vmatprep.subr.bf16.mxu1 %v1307_v1 }
  0x1a   : > { %v345_v34 = vld [vmem:[#allocation2 + $0x28] sm:$0xff]  ;;  %v340_v35 = vld [vmem:[#allocation2] sm:$0xff] }
  0x1b   : > { %1142 = vmatpush3.bf16.msra.mxu0 %v1259_v17  ;;  %v348_v36 = vpack.c.bf16 %v345_v34, %v335_v32  ;;  %667 = vst [vmem:[#allocation2 + $0x2f] sm:$0x1] %v1307_v1  ;;  %v346_v37 = vpack.c.bf16 %v329_v33, %v340_v35  ;;  %662 = vst [vmem:[#allocation2] sm:$0x1] %v1307_v1 }
  0x1c   : > { %1204 = vmatpush3.bf16.msra.mxu1 %v1260_v18  ;;  %1143 = vmatprep.subr.bf16.mxu0 %v1261_v19 }
  0x1d   : > { %1205 = vmatprep.subr.bf16.mxu1 %v1307_v1 }
  0x1f   : > { %1144 = vmatpush3.bf16.msra.mxu0 %v1262_v20 }
  0x20   : > { %1206 = vmatpush3.bf16.msra.mxu1 %v1263_v21  ;;  %1145 = vmatprep.subr.bf16.mxu0 %v1264_v22 }
  0x21   : > { %1207 = vmatprep.subr.bf16.mxu1 %v1307_v1 }
  0x23   : > { %1146 = vmatpush3.bf16.msra.mxu0 %v1265_v26 }
  0x24   : > { %1208 = vmatpush3.bf16.msra.mxu1 %v1266_v31  ;;  %1162 = vmatprep.subr.bf16.mxu0 %v1268_v38  ;;  %v1124_v38 = vld [vmem:[%s1573_s5] ss:$0 sm:$0xff] }
  0x25   : > { %1213 = vmatprep.subr.bf16.mxu1 %v1307_v1 }
  0x26   : > { %574 = vmatmul.mubr.bf16.vlgmr.msra.gmra.mrb[0].mxu0 %v346_v37 }
  0x27   : > { %1210 = vmatmul.mubr.bf16.vlgmr.msra.gmra.mrb[0].mxu1 %v348_v36  ;;  %1163 = vmatpush3.bf16.msra.mxu0 %v1269_v39 }
  0x28   : > { %1229 = vmatprep.mubr.msk.bf16.mxu1 %vm1308_vm0, %v1307_v1  ;;  %1164 = vmatprep.subr.bf16.mxu0 %v1271_v40 }
  0x29   : > { %1214 = vmatpush3.bf16.msra.mxu1 %v1267_v42  ;;  %v1125_v42 = vld [vmem:[%s1574_s6] ss:$0 sm:$0xff] }
  0x2a   : > { %1215 = vmatprep.subr.bf16.mxu1 %v1307_v1 }
  0x2b   : > { %1165 = vmatpush3.bf16.msra.mxu0 %v1272_v41 }
  0x2c   : > { %1166 = vmatprep.subr.bf16.mxu0 %v1274_v43 }
  0x2d   : > { %1216 = vmatpush3.bf16.msra.mxu1 %v1270_v45 }
  0x2e   : > { %1217 = vmatprep.subr.bf16.mxu1 %v1307_v1 }
  0x2f   : > { %1167 = vmatpush3.bf16.msra.mxu0 %v1275_v44 }
  0x30   : > { %1168 = vmatprep.subr.bf16.mxu0 %v1277_v46 }
  0x31   : > { %1218 = vmatpush3.bf16.msra.mxu1 %v1273_v48 }
  0x32   : > { %1219 = vmatprep.subr.bf16.mxu1 %v1307_v1 }
  0x33   : > { %1169 = vmatpush3.bf16.msra.mxu0 %v1278_v47 }
  0x34   : > { %1170 = vmatprep.subr.bf16.mxu0 %v1280_v49 }
  0x35   : > { %1220 = vmatpush3.bf16.msra.mxu1 %v1276_v51 }
  0x36   : > { %1221 = vmatprep.subr.bf16.mxu1 %v1307_v1 }
  0x37   : > { %1171 = vmatpush3.bf16.msra.mxu0 %v1281_v50 }
  0x38   : > { %1172 = vmatprep.subr.bf16.mxu0 %v1283_v52 }
  0x39   : > { %1222 = vmatpush3.bf16.msra.mxu1 %v1279_v54 }
  0x3a   : > { %1223 = vmatprep.subr.bf16.mxu1 %v1307_v1 }
  0x3b   : > { %1173 = vmatpush3.bf16.msra.mxu0 %v1284_v53 }
  0x3c   : > { %1174 = vmatprep.subr.bf16.mxu0 %v1286_v55 }
  0x3d   : > { %1224 = vmatpush3.bf16.msra.mxu1 %v1282_v57 }
  0x3e   : > { %1225 = vmatprep.subr.bf16.mxu1 %v1307_v1 }
  0x3f   : > { %1175 = vmatpush3.bf16.msra.mxu0 %v1287_v56 }
  0x40   : > { %1176 = vmatprep.subr.bf16.mxu0 %v1289_v58 }
  0x41   : > { %1226 = vmatpush3.bf16.msra.mxu1 %v1285_v59 }
  0x42   : > { %1227 = vmatprep.subr.bf16.mxu1 %v1307_v1  ;;  %v1099_v1 = vld [vmem:[%s1571_s3] ss:$0 sm:$0xff] }
  0x43   : > { %1177 = vmatpush3.bf16.msra.mxu0 %v1290_v60 }
  0x45   : > { %1228 = vmatpush3.bf16.msra.mxu1 %v1288_v61 }
  0xf9   : > { %v1147_v63 = vpop.f32.mrb[0].mxu0 }
  0xfa   : > { %v616_v62 = vpop.f32.mrb[0].mxu1  ;;  %v1148_v2 = vpop.f32.mrb[1].mxu0 }
  0xfb   : > { %v1211_v0 = vpop.f32.mrb[1].mxu1  ;;  %v1149_v4 = vadd.f32 %v1148_v2, %v1147_v63  ;;  %v1150_v5 = vpop.f32.mrb[2].mxu0 }
  0xfc   : > { %v619_v3 = vpop.f32.mrb[2].mxu1  ;;  %v1151_v8 = vpop.f32.mrb[3].mxu0 }
  0xfd   : > { %v1212_v6 = vpop.f32.mrb[3].mxu1  ;;  %v617_v9 = vadd.f32 %v1149_v4, %v616_v62  ;;  %v1152_v10 = vadd.f32 %v1151_v8, %v1150_v5 }
  0xff   : > { %v630_v11 = vmul.f32 %v1098_v7, %v617_v9  ;;  %v620_v12 = vadd.f32 %v1152_v10, %v619_v3 }
 0x101   : > { %v639_v13 = vadd.f32 %v1099_v1, %v630_v11  ;;  %v631_v14 = vmul.f32 %v1098_v7, %v620_v12 }
 0x103   : > { %1291 = vtanh.f32 %v639_v13  ;;  %v640_v15 = vadd.f32 %v1099_v1, %v631_v14 }
 0x105   : > { %1293 = vtanh.f32 %v640_v15 }
 0x10d   : > { %v1292_v16 = vpop.eup %1291 }
 0x10e   : > { %v643_v17 = vadd.f32 1e-08, %v1292_v16 }
 0x10f   : > { %v1294_v18 = vpop.eup %1293 }
 0x110   : > { %645 = vst [vmem:[#allocation3] sm:$0xff] %v643_v17  ;;  %v655_v19 = vrot.slane %v643_v17, 7  ;;  %v644_v20 = vadd.f32 1e-08, %v1294_v18 }
 0x112   : > { %660 = vst [vmem:[#allocation2] sm:$0xfe] %v655_v19  ;;  %646 = vst [vmem:[#allocation3 + $0x8] sm:$0xff] %v644_v20  ;;  %v675_v21 = vpack.c.bf16 %v644_v20, %v643_v17 }
 0x114   : > { %901 = vmatprep.mubr.bf16.mxu0 %v675_v21 }
 0x119   : > { %v652_v22 = vld [vmem:[#allocation3 + $0x8] sm:$0x7f]  ;;  %v668_v27 = vld [vmem:[#allocation2] sm:$0xff] }
 0x11a   : > { %v663_v23 = vld [vmem:[#allocation3 + $0x1] sm:$0xff]  ;;  %v664_v24 = vld [vmem:[#allocation3 + $0x9] sm:$0x7f]  ;;  %v656_v25 = vrot.slane %v652_v22, 7 }
 0x11b   : > { %666 = vst [vmem:[#allocation2 + $0x28] sm:$0x7f] %v664_v24 }
 0x11c   : > { %v657_v26 = vsel %vm326_vm1, %v655_v19, %v656_v25 }
 0x11d   : > { %v674_v28 = vpack.c.bf16 %v657_v26, %v668_v27 }
 0x11f   : > { %902 = vmatmul.mubr.bf16.vlgmr.msra.gmra.mrb[4].mxu0 %v674_v28 }
 0x122   : > { %v673_v29 = vld [vmem:[#allocation2 + $0x28] sm:$0xff] }
 0x123   : > { %v676_v30 = vpack.c.bf16 %v673_v29, %v663_v23 }
 0x125   : > { %1230 = vmatmul.mubr.bf16.vlgmr.msra.gmra.mrb[4].mxu1 %v676_v30 }
 0x1f2   : > { %v1178_v31 = vpop.f32.mrb[4].mxu0 }
 0x1f3   : > { %v1179_v32 = vpop.f32.mrb[5].mxu0 }
 0x1f4   : > { %v1180_v33 = vadd.f32 %v1179_v32, %v1178_v31  ;;  %v1181_v34 = vpop.f32.mrb[6].mxu0 }
 0x1f5   : > { %v1182_v35 = vpop.f32.mrb[7].mxu0 }
 0x1f6   : > { %v1183_v36 = vadd.f32 %v1182_v35, %v1181_v34 }
 0x1f8   : > { %v944_v37 = vpop.f32.mrb[4].mxu1 }
 0x1f9   : > { %v1231_v39 = vpop.f32.mrb[5].mxu1  ;;  %v945_v40 = vadd.f32 %v1180_v33, %v944_v37 }
 0x1fa   : > { %v947_v41 = vpop.f32.mrb[6].mxu1 }
 0x1fb   : > { %v1232_v43 = vpop.f32.mrb[7].mxu1  ;;  %v958_v44 = vmul.f32 %v1124_v38, %v945_v40  ;;  %v948_v45 = vadd.f32 %v1183_v36, %v947_v41 }
 0x1fd   : > { %v967_v46 = vadd.f32 %v1125_v42, %v958_v44  ;;  %v959_v47 = vmul.f32 %v1124_v38, %v948_v45 }
 0x1ff   : > { %1295 = vtanh.f32 %v967_v46  ;;  %v968_v48 = vadd.f32 %v1125_v42, %v959_v47 }
 0x201   : > { %1297 = vtanh.f32 %v968_v48 }
 0x209   : > { %v1296_v49 = vpop.eup %1295 }
 0x20a   : > { %971 = vst [vmem:[%s312_s20] sm:$0xff] %v1296_v49 }
 0x20b   : > { %v1298_v50 = vpop.eup %1297 }
 0x20c   : > { %972 = vst [vmem:[%s312_s20 + $0x8] sm:$0xff] %v1298_v50 }
 0x213   : > { %v973_v51 = vld [vmem:[%s312_s20] ss:$2 sm:$0xff]  ;;  %v1126_v52 = vld [vmem:[%s312_s20 + $0x1] ss:$2 sm:$0xff] }
 0x214   : > { %v976_v53 = vmax.f32 %v973_v51, %v1126_v52 }
 0x216   : > { %977 = vst [vmem:[%s316_s25] sm:$0xff] %v976_v53 }
 0x217 PF: > { %s19_s27 = sadd.s32 1, %s1305_s27  }
 0x218   : > { %p16_p4 = scmp.ge.s32.totalorder %s19_s27, 4  }
 0x21a   :  { %18 = sbr.rel (!%p16_p4) target bundleno = 1 (0x1), region = 91 }

</bundles_post_ra>
